<compile_context>
chip_gen: v7x
topology: tpu7x:2x2x1
jax: 0.10.0
libtpu: 0.0.40
codegen_flags: <defaults>
</compile_context>

<pallas_src>
import functools

import jax
import jax.numpy as jnp
import numpy as np
from jax import lax
from jax.experimental import pallas as pl
from jax.experimental.pallas import tpu as pltpu

EPS = 1e-5          # cBatchNorm2d epsilon
DET_FLOOR = 1e-20   # clamp for the 2x2 covariance determinant (fp safety)


def _round_up(x, m):
    return (x + m - 1) // m * m


def _swap_halves(x, cp):
    """Swap the real/imag channel halves along the sublane axis.

    x is [2*cp, L] with rows [real | imag]; cp is a multiple of 8, so both
    slices are (8,128)-tile aligned (tile-level copy, no relayout).
    """
    return jnp.concatenate([x[cp:], x[:cp]], axis=0)


# ----------------------------------------------------------------------------
# Pallas kernel: fused complex conv (one matmul) + complex BN + PReLU.
# ----------------------------------------------------------------------------
def _encoder_block_kernel(p_ref, wp_ref, par_ref, slope_ref, o_ref, stats_ref,
                          *, m_real, cp):
    # p_ref    : [2K, tile_M]    transposed im2col patches ([real ; imag] rows)
    # wp_ref   : [2*cp, 2K]      fused complex weights (real rows, then imag)
    # par_ref  : [2*cp, 8]       col0 bias, col1 gA, col2 gB, col3 beta
    # slope_ref: [1, 1]  (SMEM)  PReLU slope
    # o_ref    : [2*cp, tile_M]  output block ([real ; imag] rows)
    # stats_ref: [2*cp, 8]       col0 sum, col1 sum_sq, col2 cross-sum (scratch)
    stage = pl.program_id(0)     # 0 = accumulate stats, 1 = normalize + write
    tile = pl.program_id(1)
    tm = o_ref.shape[1]

    # --- fused complex conv: ONE MXU matmul, channels on sublanes, M on lanes
    y = jnp.dot(wp_ref[...], p_ref[...], preferred_element_type=jnp.float32)
    y = y + par_ref[:, 0:1]                         # conv bias per output row

    # lane mask: global column index < real M (exclude M-padding columns)
    col = tile * tm + lax.broadcasted_iota(jnp.int32, (1, tm), 1)
    mask = (col < m_real).astype(jnp.float32)       # [1, tm]

    @pl.when(jnp.logical_and(stage == 0, tile == 0))
    def _init():
        stats_ref[...] = jnp.zeros_like(stats_ref)

    @pl.when(stage == 0)
    def _accumulate():
        ym = y * mask                               # masked values
        ysw = _swap_halves(ym, cp)                  # [imag ; real]
        stats_ref[:, 0:1] += jnp.sum(ym, axis=1, keepdims=True)
        stats_ref[:, 1:2] += jnp.sum(ym * y, axis=1, keepdims=True)
        stats_ref[:, 2:3] += jnp.sum(ym * ysw, axis=1, keepdims=True)

    @pl.when(stage == 1)
    def _normalize():
        inv_m = jnp.float32(1.0 / m_real)
        st = stats_ref[...]
        mean = st[:, 0:1] * inv_m                   # [mu_r ; mu_i]
        e2 = st[:, 1:2] * inv_m                     # [E yr^2 ; E yi^2]
        exy = st[:, 2:3] * inv_m                    # E[yr*yi]  (both halves)
        var = e2 - mean * mean + EPS                # [Vrr ; Vii]
        mean_sw = _swap_halves(mean, cp)            # [mu_i ; mu_r]
        var_sw = _swap_halves(var, cp)              # [Vii ; Vrr]
        cov = exy - mean * mean_sw                  # Vri      (both halves)

        # inverse square root of the per-channel 2x2 covariance matrix
        det = jnp.maximum(var * var_sw - cov * cov, DET_FLOOR)
        s = jnp.sqrt(det)
        t = jnp.sqrt(var + var_sw + 2.0 * s)
        inv_st = 1.0 / (s * t)                      # exact: tiny [2*cp,1] vec
        w_a = (var_sw + s) * inv_st                 # [w_rr ; w_ii]
        w_b = -cov * inv_st                         # [w_ri ; w_ri]

        xc = y - mean
        xsw = _swap_halves(xc, cp)
        nrm = w_a * xc + w_b * xsw                  # [nr ; ni]
        nsw = _swap_halves(nrm, cp)                 # [ni ; nr]
        z = par_ref[:, 1:2] * nrm + par_ref[:, 2:3] * nsw + par_ref[:, 3:4]

        a = slope_ref[0, 0]                         # PReLU slope (SMEM scalar)
        o_ref[...] = jnp.where(z >= 0.0, z, a * z)


# ----------------------------------------------------------------------------
# Glue: transposed im2col, weight/param packing, pallas_call wrapper.
# ----------------------------------------------------------------------------
def _im2col_t(x, kh, kw, sh, sw, ph, pw):
    # x: [N, C, H, W] -> transposed patches [C*kh*kw, N*Ho*Wo], row order (c, i*kw+j)
    xp = jnp.pad(x, ((0, 0), (0, 0), (ph, ph), (pw, pw)))
    n, c, hp, wp_ = xp.shape
    ho = (hp - kh) // sh + 1
    wo = (wp_ - kw) // sw + 1
    cols = []
    for i in range(kh):
        for j in range(kw):
            cols.append(xp[:, :, i:i + (ho - 1) * sh + 1:sh,
                              j:j + (wo - 1) * sw + 1:sw])
    patches = jnp.stack(cols, axis=2)               # [N, C, kh*kw, Ho, Wo]
    patches = patches.transpose(1, 2, 0, 3, 4)      # [C, kh*kw, N, Ho, Wo]
    return patches.reshape(c * kh * kw, n * ho * wo), ho, wo


@functools.partial(jax.jit,
                   static_argnames=("kernel_size", "stride", "padding", "tile_m"))
def encoder_block(x, params, kernel_size, stride, padding, tile_m=256):
    """x: [N, 2*Ci, H, W] float32 (NCHW, channels = [real | imag])."""
    kh, kw = kernel_size
    sh, sw = stride
    ph, pw = padding
    assert tile_m % 128 == 0
    wr, wi, br, bi, g_rr, g_ri, g_ii, beta_r, beta_i, prelu_a = params
    co, ci = wr.shape[0], wr.shape[1]
    co_p = _round_up(co, 8)          # pad complex channels to a sublane tile

    n = x.shape[0]
    xr = x[:, :ci]
    xi = x[:, ci:]
    pr_t, ho, wo = _im2col_t(xr, kh, kw, sh, sw, ph, pw)     # [K, M]
    pi_t, _, _ = _im2col_t(xi, kh, kw, sh, sw, ph, pw)
    m = n * ho * wo
    k = ci * kh * kw

    m_pad = _round_up(m, tile_m)
    num_tiles = m_pad // tile_m

    # Transposed, lane-dense patch matrix [2K, M_pad], rows = [real ; imag].
    pt = jnp.concatenate([pr_t, pi_t], axis=0)               # [2K, M]
    pt = jnp.pad(pt, ((0, 0), (0, m_pad - m)))

    # Fused complex weight: rows 0..co-1 -> real plane, co_p..co_p+co-1 -> imag.
    wr_mat = wr.reshape(co, k)
    wi_mat = wi.reshape(co, k)
    w_real_rows = jnp.concatenate([wr_mat, -wi_mat], axis=1)  # [Co, 2K]
    w_imag_rows = jnp.concatenate([wi_mat, wr_mat], axis=1)   # [Co, 2K]
    wp = jnp.zeros((2 * co_p, 2 * k), jnp.float32)
    wp = wp.at[:co].set(w_real_rows).at[co_p:co_p + co].set(w_imag_rows)

    # Per-output-row parameters: col0 bias, col1 gA, col2 gB, col3 beta.
    par = jnp.zeros((2 * co_p, 8), jnp.float32)
    par = par.at[:co, 0].set(br - bi).at[co_p:co_p + co, 0].set(br + bi)
    par = par.at[:co, 1].set(g_rr).at[co_p:co_p + co, 1].set(g_ii)
    par = par.at[:co, 2].set(g_ri).at[co_p:co_p + co, 2].set(g_ri)
    par = par.at[:co, 3].set(beta_r).at[co_p:co_p + co, 3].set(beta_i)
    slope = jnp.full((1, 1), prelu_a, jnp.float32)

    kernel = functools.partial(_encoder_block_kernel, m_real=m, cp=co_p)
    out_t = pl.pallas_call(
        kernel,
        out_shape=jax.ShapeDtypeStruct((2 * co_p, m_pad), jnp.float32),
        grid=(2, num_tiles),
        in_specs=[
            pl.BlockSpec((2 * k, tile_m), lambda s, t: (0, t)),
            pl.BlockSpec((2 * co_p, 2 * k), lambda s, t: (0, 0)),
            pl.BlockSpec((2 * co_p, 8), lambda s, t: (0, 0)),
            pl.BlockSpec(memory_space=pltpu.MemorySpace.SMEM),
        ],
        out_specs=pl.BlockSpec((2 * co_p, tile_m), lambda s, t: (0, t)),
        scratch_shapes=[pltpu.VMEM((2 * co_p, 8), jnp.float32)],
        compiler_params=pltpu.CompilerParams(
            dimension_semantics=("arbitrary", "arbitrary")),
    )(pt, wp, par, slope)

    # Back to NCHW with channels [real | imag].
    # TODO(synk): downstream DCCRN blocks could consume the kernel-native
    # [2*Co_pad, N*Ho*Wo] layout directly and skip this transpose round trip.
    out_r = out_t[:co, :m].reshape(co, n, ho, wo).transpose(1, 0, 2, 3)
    out_i = out_t[co_p:co_p + co, :m].reshape(co, n, ho, wo).transpose(1, 0, 2, 3)
    return jnp.concatenate([out_r, out_i], axis=1)            # [N, 2*Co, Ho, Wo]


# ----------------------------------------------------------------------------
# Pure-JAX reference (uses lax.conv) for correctness checking.
# ----------------------------------------------------------------------------
def encoder_block_ref(x, params, stride, padding):
    wr, wi, br, bi, g_rr, g_ri, g_ii, beta_r, beta_i, prelu_a = params
    ci = wr.shape[1]
    xr, xi = x[:, :ci], x[:, ci:]

    def conv(inp, w, b):
        o = jax.lax.conv_general_dilated(
            inp, w, window_strides=stride,
            padding=[(padding[0], padding[0]), (padding[1], padding[1])],
            dimension_numbers=("NCHW", "OIHW", "NCHW"))
        return o + b[None, :, None, None]

    yr = conv(xr, wr, br) - conv(xi, wi, bi)
    yi = conv(xr, wi, bi) + conv(xi, wr, br)

    axes = (0, 2, 3)
    mu_r = yr.mean(axes, keepdims=True)
    mu_i = yi.mean(axes, keepdims=True)
    cr, c_i = yr - mu_r, yi - mu_i
    vrr = (cr * cr).mean(axes, keepdims=True) + EPS
    vii = (c_i * c_i).mean(axes, keepdims=True) + EPS
    vri = (cr * c_i).mean(axes, keepdims=True)
    s = jnp.sqrt(vrr * vii - vri * vri)
    t = jnp.sqrt(vrr + vii + 2.0 * s)
    ist = 1.0 / (s * t)
    w_rr, w_ii, w_ri = (vii + s) * ist, (vrr + s) * ist, -vri * ist
    nr = w_rr * cr + w_ri * c_i
    ni = w_ri * cr + w_ii * c_i

    def bc(v):
        return v[None, :, None, None]

    zr = bc(g_rr) * nr + bc(g_ri) * ni + bc(beta_r)
    zi = bc(g_ri) * nr + bc(g_ii) * ni + bc(beta_i)
    z = jnp.concatenate([zr, zi], axis=1)
    return jnp.where(z >= 0.0, z, prelu_a * z)


if __name__ == "__main__":
    # Small shapes consistent with the module: complex channels 2 -> 4.
    # M = N*Ho*Wo = 2*8*12 = 192, tile_m = 128 -> 2 M-tiles + active lane mask,
    # exercising the multi-tile accumulated-BN path.
    N, CIN, H, W = 2, 4, 16, 12          # x: [N, 2*Ci, H(freq), W(time)]
    COUT = 8
    KERNEL = (3, 3)
    STRIDE = (2, 1)
    PADDING = (1, 1)
    ci, co = CIN // 2, COUT // 2

    key = jax.random.PRNGKey(0)
    ks = jax.random.split(key, 8)
    x = jax.random.normal(ks[0], (N, CIN, H, W), jnp.float32)

    # Deterministic parameter init (synthetic; matches the module's shapes).
    wr = 0.2 * jax.random.normal(ks[1], (co, ci) + KERNEL, jnp.float32)
    wi = 0.2 * jax.random.normal(ks[2], (co, ci) + KERNEL, jnp.float32)
    br = 0.1 * jax.random.normal(ks[3], (co,), jnp.float32)
    bi = 0.1 * jax.random.normal(ks[4], (co,), jnp.float32)
    inv_sqrt2 = 1.0 / np.sqrt(2.0)
    g_rr = inv_sqrt2 + 0.05 * jax.random.normal(ks[5], (co,), jnp.float32)
    g_ii = inv_sqrt2 + 0.05 * jax.random.normal(ks[6], (co,), jnp.float32)
    g_ri = 0.05 * jax.random.normal(ks[7], (co,), jnp.float32)
    beta_r = jnp.zeros((co,), jnp.float32)
    beta_i = jnp.zeros((co,), jnp.float32)
    prelu_a = 0.25  # nn.PReLU() default init

    params = (wr, wi, br, bi, g_rr, g_ri, g_ii, beta_r, beta_i, prelu_a)

    out = encoder_block(x, params, KERNEL, STRIDE, PADDING, tile_m=128)
    out = jax.block_until_ready(out)

    ref = encoder_block_ref(x, params, STRIDE, PADDING)
    np.testing.assert_allclose(np.asarray(out), np.asarray(ref),
                               rtol=1e-4, atol=1e-4)
    print("KERNEL_OK")
</pallas_src>

<mosaic_0001>
module attributes {stable_mosaic.version = 11 : i64} {
  func.func @_encoder_block_kernel(%arg0: i32, %arg1: i32, %arg2: memref<36x128xf32, #tpu.memory_space<vmem>>, %arg3: memref<16x36xf32, #tpu.memory_space<vmem>>, %arg4: memref<16x8xf32, #tpu.memory_space<vmem>>, %arg5: memref<1x1xf32, #tpu.memory_space<smem>>, %arg6: memref<16x128xf32, #tpu.memory_space<vmem>>, %arg7: memref<16x8xf32, #tpu.memory_space<vmem>>) attributes {dimension_semantics = [#tpu.dimension_semantics<arbitrary>, #tpu.dimension_semantics<arbitrary>], iteration_bounds = array<i64: 2, 2>, scalar_prefetch = 0 : i64, scratch_operands = 1 : i64, tpu.core_type = #tpu.core_type<tc>, window_params = [{transform_indices = @transform_0, window_bounds = array<i64: 36, 128>}, {pipeline_mode = #tpu.pipeline_mode<synchronous>, transform_indices = @transform_1, window_bounds = array<i64: 16, 36>}, {pipeline_mode = #tpu.pipeline_mode<synchronous>, transform_indices = @transform_2, window_bounds = array<i64: 16, 8>}, {transform_indices = @transform_3, window_bounds = array<i64: 1, 1>}, {transform_indices = @transform_4, window_bounds = array<i64: 16, 128>}]} {
    %c0 = arith.constant 0 : index
    %c0_0 = arith.constant 0 : index
    %0 = vector.load %arg3[%c0, %c0_0] : memref<16x36xf32, #tpu.memory_space<vmem>>, vector<16x36xf32>
    %c0_1 = arith.constant 0 : index
    %c0_2 = arith.constant 0 : index
    %1 = vector.load %arg2[%c0_1, %c0_2] : memref<36x128xf32, #tpu.memory_space<vmem>>, vector<36x128xf32>
    %cst = arith.constant dense<0.000000e+00> : vector<16x128xf32>
    %2 = tpu.matmul %0, %1, %cst {dimension_numbers = #tpu.dot_dimension_numbers<[1], [0], [0], [1], [0, 0, 1, 1], [], []>} : vector<16x36xf32>, vector<36x128xf32>, vector<16x128xf32> -> vector<16x128xf32>
    %c0_3 = arith.constant 0 : index
    %c0_4 = arith.constant 0 : index
    %3 = vector.load %arg4[%c0_3, %c0_4] : memref<16x8xf32, #tpu.memory_space<vmem>>, vector<16x1xf32>
    %4 = vector.broadcast %3 : vector<16x1xf32> to vector<16x128xf32>
    %5 = arith.addf %2, %4 : vector<16x128xf32>
    %c128_i32 = arith.constant 128 : i32
    %6 = arith.muli %arg1, %c128_i32 : i32
    %7 = tpu.iota {dimensions = array<i32: 1>} : vector<1x128xi32>
    %8 = vector.broadcast %6 : i32 to vector<1x128xi32>
    %9 = arith.addi %8, %7 : vector<1x128xi32>
    %c192_i32 = arith.constant 192 : i32
    %10 = vector.broadcast %c192_i32 : i32 to vector<1x128xi32>
    %11 = arith.cmpi slt, %9, %10 : vector<1x128xi32>
    %12 = arith.extui %11 : vector<1x128xi1> to vector<1x128xi32>
    %13 = arith.sitofp %12 : vector<1x128xi32> to vector<1x128xf32>
    %c0_i32 = arith.constant 0 : i32
    %14 = arith.cmpi eq, %arg0, %c0_i32 : i32
    %c0_i32_5 = arith.constant 0 : i32
    %15 = arith.cmpi eq, %arg1, %c0_i32_5 : i32
    %16 = arith.andi %14, %15 : i1
    %17 = arith.extui %16 : i1 to i32
    %c0_i32_6 = arith.constant 0 : i32
    %18 = arith.cmpi ne, %17, %c0_i32_6 : i32
    scf.if %18 {
      %cst_10 = arith.constant 0.000000e+00 : f32
      %25 = vector.broadcast %cst_10 : f32 to vector<16x8xf32>
      %c0_11 = arith.constant 0 : index
      %c0_12 = arith.constant 0 : index
      %26 = vector.load %arg7[%c0_11, %c0_12] : memref<16x8xf32, #tpu.memory_space<vmem>>, vector<16x8xf32>
      tpu.vector_store %arg7[%c0_11, %c0_12], %25 {strides = array<i32>} : memref<16x8xf32, #tpu.memory_space<vmem>>, vector<16x8xf32>,
    } else {
    }
    %c0_i32_7 = arith.constant 0 : i32
    %19 = arith.cmpi eq, %arg0, %c0_i32_7 : i32
    %20 = arith.extui %19 : i1 to i32
    %c0_i32_8 = arith.constant 0 : i32
    %21 = arith.cmpi ne, %20, %c0_i32_8 : i32
    scf.if %21 {
      %25 = vector.broadcast %13 : vector<1x128xf32> to vector<16x128xf32>
      %26 = arith.mulf %5, %25 : vector<16x128xf32>
      %27 = vector.extract_strided_slice %26 {offsets = [8, 0], sizes = [8, 128], strides = [1, 1]} : vector<16x128xf32> to vector<8x128xf32>
      %28 = vector.extract_strided_slice %26 {offsets = [0, 0], sizes = [8, 128], strides = [1, 1]} : vector<16x128xf32> to vector<8x128xf32>
      %29 = tpu.concatenate %27, %28 in 0 : vector<8x128xf32>, vector<8x128xf32> -> vector<16x128xf32>
      %c0_10 = arith.constant 0 : index
      %c0_11 = arith.constant 0 : index
      %30 = vector.load %arg7[%c0_10, %c0_11] : memref<16x8xf32, #tpu.memory_space<vmem>>, vector<16x1xf32>
      %cst_12 = arith.constant dense<0.000000e+00> : vector<16xf32>
      %31 = vector.multi_reduction <add>, %26, %cst_12 [1] : vector<16x128xf32> to vector<16xf32>
      %32 = vector.shape_cast %31 : vector<16xf32> to vector<16x1xf32>
      %33 = arith.addf %30, %32 : vector<16x1xf32>
      %c0_13 = arith.constant 0 : index
      %c0_14 = arith.constant 0 : index
      %34 = vector.load %arg7[%c0_13, %c0_14] : memref<16x8xf32, #tpu.memory_space<vmem>>, vector<16x1xf32>
      tpu.vector_store %arg7[%c0_13, %c0_14], %33 {strides = array<i32>} : memref<16x8xf32, #tpu.memory_space<vmem>>, vector<16x1xf32>,
      %c0_15 = arith.constant 0 : index
      %c1 = arith.constant 1 : index
      %35 = vector.load %arg7[%c0_15, %c1] : memref<16x8xf32, #tpu.memory_space<vmem>>, vector<16x1xf32>
      %36 = arith.mulf %26, %5 : vector<16x128xf32>
      %cst_16 = arith.constant dense<0.000000e+00> : vector<16xf32>
      %37 = vector.multi_reduction <add>, %36, %cst_16 [1] : vector<16x128xf32> to vector<16xf32>
      %38 = vector.shape_cast %37 : vector<16xf32> to vector<16x1xf32>
      %39 = arith.addf %35, %38 : vector<16x1xf32>
      %c0_17 = arith.constant 0 : index
      %c1_18 = arith.constant 1 : index
      %40 = vector.load %arg7[%c0_17, %c1_18] : memref<16x8xf32, #tpu.memory_space<vmem>>, vector<16x1xf32>
      tpu.vector_store %arg7[%c0_17, %c1_18], %39 {strides = array<i32>} : memref<16x8xf32, #tpu.memory_space<vmem>>, vector<16x1xf32>,
      %c0_19 = arith.constant 0 : index
      %c2 = arith.constant 2 : index
      %41 = vector.load %arg7[%c0_19, %c2] : memref<16x8xf32, #tpu.memory_space<vmem>>, vector<16x1xf32>
      %42 = arith.mulf %26, %29 : vector<16x128xf32>
      %cst_20 = arith.constant dense<0.000000e+00> : vector<16xf32>
      %43 = vector.multi_reduction <add>, %42, %cst_20 [1] : vector<16x128xf32> to vector<16xf32>
      %44 = vector.shape_cast %43 : vector<16xf32> to vector<16x1xf32>
      %45 = arith.addf %41, %44 : vector<16x1xf32>
      %c0_21 = arith.constant 0 : index
      %c2_22 = arith.constant 2 : index
      %46 = vector.load %arg7[%c0_21, %c2_22] : memref<16x8xf32, #tpu.memory_space<vmem>>, vector<16x1xf32>
      tpu.vector_store %arg7[%c0_21, %c2_22], %45 {strides = array<i32>} : memref<16x8xf32, #tpu.memory_space<vmem>>, vector<16x1xf32>,
    } else {
    }
    %c1_i32 = arith.constant 1 : i32
    %22 = arith.cmpi eq, %arg0, %c1_i32 : i32
    %23 = arith.extui %22 : i1 to i32
    %c0_i32_9 = arith.constant 0 : i32
    %24 = arith.cmpi ne, %23, %c0_i32_9 : i32
    scf.if %24 {
      %c0_10 = arith.constant 0 : index
      %c0_11 = arith.constant 0 : index
      %25 = vector.load %arg7[%c0_10, %c0_11] : memref<16x8xf32, #tpu.memory_space<vmem>>, vector<16x8xf32>
      %26 = vector.extract_strided_slice %25 {offsets = [0, 0], sizes = [16, 1], strides = [1, 1]} : vector<16x8xf32> to vector<16x1xf32>
      %cst_12 = arith.constant 0.00520833349 : f32
      %27 = vector.broadcast %cst_12 : f32 to vector<16x1xf32>
      %28 = arith.mulf %26, %27 : vector<16x1xf32>
      %29 = vector.extract_strided_slice %25 {offsets = [0, 1], sizes = [16, 1], strides = [1, 1]} : vector<16x8xf32> to vector<16x1xf32>
      %cst_13 = arith.constant 0.00520833349 : f32
      %30 = vector.broadcast %cst_13 : f32 to vector<16x1xf32>
      %31 = arith.mulf %29, %30 : vector<16x1xf32>
      %32 = vector.extract_strided_slice %25 {offsets = [0, 2], sizes = [16, 1], strides = [1, 1]} : vector<16x8xf32> to vector<16x1xf32>
      %cst_14 = arith.constant 0.00520833349 : f32
      %33 = vector.broadcast %cst_14 : f32 to vector<16x1xf32>
      %34 = arith.mulf %32, %33 : vector<16x1xf32>
      %35 = arith.mulf %28, %28 : vector<16x1xf32>
      %36 = arith.subf %31, %35 : vector<16x1xf32>
      %cst_15 = arith.constant 9.99999974E-6 : f32
      %37 = vector.broadcast %cst_15 : f32 to vector<16x1xf32>
      %38 = arith.addf %36, %37 : vector<16x1xf32>
      %39 = vector.extract_strided_slice %28 {offsets = [8, 0], sizes = [8, 1], strides = [1, 1]} : vector<16x1xf32> to vector<8x1xf32>
      %40 = vector.extract_strided_slice %28 {offsets = [0, 0], sizes = [8, 1], strides = [1, 1]} : vector<16x1xf32> to vector<8x1xf32>
      %41 = tpu.concatenate %39, %40 in 0 : vector<8x1xf32>, vector<8x1xf32> -> vector<16x1xf32>
      %42 = vector.extract_strided_slice %38 {offsets = [8, 0], sizes = [8, 1], strides = [1, 1]} : vector<16x1xf32> to vector<8x1xf32>
      %43 = vector.extract_strided_slice %38 {offsets = [0, 0], sizes = [8, 1], strides = [1, 1]} : vector<16x1xf32> to vector<8x1xf32>
      %44 = tpu.concatenate %42, %43 in 0 : vector<8x1xf32>, vector<8x1xf32> -> vector<16x1xf32>
      %45 = arith.mulf %28, %41 : vector<16x1xf32>
      %46 = arith.subf %34, %45 : vector<16x1xf32>
      %47 = arith.mulf %38, %44 : vector<16x1xf32>
      %48 = arith.mulf %46, %46 : vector<16x1xf32>
      %49 = arith.subf %47, %48 : vector<16x1xf32>
      %cst_16 = arith.constant 9.99999968E-21 : f32
      %50 = vector.broadcast %cst_16 : f32 to vector<16x1xf32>
      %51 = arith.maximumf %49, %50 : vector<16x1xf32>
      %52 = math.sqrt %51 : vector<16x1xf32>
      %53 = arith.addf %38, %44 : vector<16x1xf32>
      %cst_17 = arith.constant 2.000000e+00 : f32
      %54 = vector.broadcast %cst_17 : f32 to vector<16x1xf32>
      %55 = arith.mulf %54, %52 : vector<16x1xf32>
      %56 = arith.addf %53, %55 : vector<16x1xf32>
      %57 = math.sqrt %56 : vector<16x1xf32>
      %58 = arith.mulf %52, %57 : vector<16x1xf32>
      %cst_18 = arith.constant 1.000000e+00 : f32
      %59 = vector.broadcast %cst_18 : f32 to vector<16x1xf32>
      %60 = arith.divf %59, %58 : vector<16x1xf32>
      %61 = arith.addf %44, %52 : vector<16x1xf32>
      %62 = arith.mulf %61, %60 : vector<16x1xf32>
      %cst_19 = arith.constant 0.000000e+00 : f32
      %63 = vector.broadcast %cst_19 : f32 to vector<16x1xf32>
      %64 = arith.subf %63, %46 : vector<16x1xf32>
      %65 = arith.mulf %64, %60 : vector<16x1xf32>
      %66 = vector.broadcast %28 : vector<16x1xf32> to vector<16x128xf32>
      %67 = arith.subf %5, %66 : vector<16x128xf32>
      %68 = vector.extract_strided_slice %67 {offsets = [8, 0], sizes = [8, 128], strides = [1, 1]} : vector<16x128xf32> to vector<8x128xf32>
      %69 = vector.extract_strided_slice %67 {offsets = [0, 0], sizes = [8, 128], strides = [1, 1]} : vector<16x128xf32> to vector<8x128xf32>
      %70 = tpu.concatenate %68, %69 in 0 : vector<8x128xf32>, vector<8x128xf32> -> vector<16x128xf32>
      %71 = vector.broadcast %62 : vector<16x1xf32> to vector<16x128xf32>
      %72 = arith.mulf %71, %67 : vector<16x128xf32>
      %73 = vector.broadcast %65 : vector<16x1xf32> to vector<16x128xf32>
      %74 = arith.mulf %73, %70 : vector<16x128xf32>
      %75 = arith.addf %72, %74 : vector<16x128xf32>
      %76 = vector.extract_strided_slice %75 {offsets = [8, 0], sizes = [8, 128], strides = [1, 1]} : vector<16x128xf32> to vector<8x128xf32>
      %77 = vector.extract_strided_slice %75 {offsets = [0, 0], sizes = [8, 128], strides = [1, 1]} : vector<16x128xf32> to vector<8x128xf32>
      %78 = tpu.concatenate %76, %77 in 0 : vector<8x128xf32>, vector<8x128xf32> -> vector<16x128xf32>
      %c0_20 = arith.constant 0 : index
      %c1 = arith.constant 1 : index
      %79 = vector.load %arg4[%c0_20, %c1] : memref<16x8xf32, #tpu.memory_space<vmem>>, vector<16x1xf32>
      %80 = vector.broadcast %79 : vector<16x1xf32> to vector<16x128xf32>
      %81 = arith.mulf %80, %75 : vector<16x128xf32>
      %c0_21 = arith.constant 0 : index
      %c2 = arith.constant 2 : index
      %82 = vector.load %arg4[%c0_21, %c2] : memref<16x8xf32, #tpu.memory_space<vmem>>, vector<16x1xf32>
      %83 = vector.broadcast %82 : vector<16x1xf32> to vector<16x128xf32>
      %84 = arith.mulf %83, %78 : vector<16x128xf32>
      %85 = arith.addf %81, %84 : vector<16x128xf32>
      %c0_22 = arith.constant 0 : index
      %c3 = arith.constant 3 : index
      %86 = vector.load %arg4[%c0_22, %c3] : memref<16x8xf32, #tpu.memory_space<vmem>>, vector<16x1xf32>
      %87 = vector.broadcast %86 : vector<16x1xf32> to vector<16x128xf32>
      %88 = arith.addf %85, %87 : vector<16x128xf32>
      %c0_23 = arith.constant 0 : index
      %c0_24 = arith.constant 0 : index
      %89 = memref.load %arg5[%c0_23, %c0_24] : memref<1x1xf32, #tpu.memory_space<smem>>
      %cst_25 = arith.constant 0.000000e+00 : f32
      %90 = vector.broadcast %cst_25 : f32 to vector<16x128xf32>
      %91 = arith.cmpf oge, %88, %90 : vector<16x128xf32>
      %92 = vector.broadcast %89 : f32 to vector<16x128xf32>
      %93 = arith.mulf %92, %88 : vector<16x128xf32>
      %94 = arith.select %91, %88, %93 : vector<16x128xi1>, vector<16x128xf32>
      %c0_26 = arith.constant 0 : index
      %c0_27 = arith.constant 0 : index
      %95 = vector.load %arg6[%c0_26, %c0_27] : memref<16x128xf32, #tpu.memory_space<vmem>>, vector<16x128xf32>
      tpu.vector_store %arg6[%c0_26, %c0_27], %94 {strides = array<i32>} : memref<16x128xf32, #tpu.memory_space<vmem>>, vector<16x128xf32>,
    } else {
    }
    return
  }
  func.func @transform_0(%arg0: i32, %arg1: i32) -> (i32, i32) {
    %c0_i32 = arith.constant 0 : i32
    %c0_i32_0 = arith.constant 0 : i32
    return %c0_i32, %arg1 : i32, i32
  }
  func.func @transform_1(%arg0: i32, %arg1: i32) -> (i32, i32) {
    %c0_i32 = arith.constant 0 : i32
    %c0_i32_0 = arith.constant 0 : i32
    %c0_i32_1 = arith.constant 0 : i32
    return %c0_i32, %c0_i32_0 : i32, i32
  }
  func.func @transform_2(%arg0: i32, %arg1: i32) -> (i32, i32) {
    %c0_i32 = arith.constant 0 : i32
    %c0_i32_0 = arith.constant 0 : i32
    %c0_i32_1 = arith.constant 0 : i32
    return %c0_i32, %c0_i32_0 : i32, i32
  }
  func.func @transform_3(%arg0: i32, %arg1: i32) -> (i32, i32) {
    %c0_i32 = arith.constant 0 : i32
    %c0_i32_0 = arith.constant 0 : i32
    %c0_i32_1 = arith.constant 0 : i32
    return %c0_i32, %c0_i32_0 : i32, i32
  }
  func.func @transform_4(%arg0: i32, %arg1: i32) -> (i32, i32) {
    %c0_i32 = arith.constant 0 : i32
    %c0_i32_0 = arith.constant 0 : i32
    return %c0_i32, %arg1 : i32, i32
  }
}

</mosaic_0001>

<bundles_post_ra>
// kernel: neg.1
= control target key start
LH: loop header
LB: loop body
LE: loop exit
PB: predicated region body
PF: predicated region fallthrough
CT: control target
= control target key end

     0   :  { %s24_s0 = inlined_call_operand.vmem [shape: f32[4,18], index: 0, kind: input, shape index: {}]   ;;  %s25_s1 = inlined_call_operand.vmem [shape: f32[4,18], index: 1, kind: output, shape index: {}]  }
   0x1   :  { %v2_v0 = vld [vmem:[%s24_s0] sm:$0xf] }
   0x2   :  { %v5_v1 = vxor.u32 2147483648, %v2_v0 }
   0x4   :  { %7 = vst [vmem:[%s25_s1] sm:$0xf] %v5_v1 }

// kernel: encoder_block.1
= control target key start
LH: loop header
LB: loop body
LE: loop exit
PB: predicated region body
PF: predicated region fallthrough
CT: control target
= control target key end

     0   :  { %s1119_s0 = inlined_call_operand.vmem [shape: f32[36,256], index: 0, kind: input, shape index: {}]   ;;  %s1120_s1 = inlined_call_operand.vmem [shape: f32[16,36], index: 1, kind: input, shape index: {}]   ;;  %s1121_s2 = inlined_call_operand.vmem [shape: f32[16,8], index: 2, kind: input, shape index: {}]   ;;  %s1122_s3 = inlined_call_operand.<no memory space> [shape: f32[1,1], index: 3, kind: input, shape index: {}]   ;;  %s1123_s4 = inlined_call_operand.vmem [shape: f32[16,256], index: 4, kind: output, shape index: {}]  }
   0x1   :  { %9 = sst [smem:[#allocation3]] %s1122_s3 }
   0x2   :  { %s943_s17 = smov 0   ;;  %s945_s18 = smov 0  }
   0x3   :  { %s947_s19 = smov 0   ;;  %s949_s20 = smov 0  }
   0x4   :  { %s951_s21 = smov 0   ;;  %s953_s22 = smov 0  }
   0x5   :  { %s955_s23 = smov 0  }
   0x6 LB: > { %s712_s3 = sadd.s32 4294967295, %s903_s23   ;;  %s24_s24 = sadd.s32 1, %s895_s21  ;;  %s903_s23 = sphi %s955_s23, %s15_s23   ;;  %s899_s22 = sphi %s953_s22, %s1130_s22   ;;  %s895_s21 = sphi %s951_s21, %s1129_s21   ;;  %s891_s20 = sphi %s949_s20, %s1128_s20   ;;  %s887_s19 = sphi %s947_s19, %s1127_s19   ;;  %s883_s18 = sphi %s945_s18, %s1126_s18   ;;  %s879_s17 = sphi %s943_s17, %s1125_s17  }
   0x7   : > { %p25_p0 = scmp.ge.s32.totalorder %s24_s24, 2  ;;  %s27_s25 = sadd.s32 1, %s899_s22 }
   0x8   : > { %s34_s26 = sadd.s32 1, %s883_s18  ;;  %p41_p1 = scmp.ne.s32.totalorder %s883_s18, %s879_s17 }
   0x9   : > { %s1132_s24 = smov (%p25_p0, %s24_s24), 0  ;;  %s1134_s25 = smov (!%p25_p0, %s27_s25), %s899_s22 }
   0xa   : > { %s31_s27 = ssub.s32 %s895_s21, %s1132_s24  ;;  %p42_p2 = scmp.eq.s32.totalorder %s903_s23, 0 }
   0xb   : > { %p29_p3 = scmp.ge.s32.totalorder %s1134_s25, 2  ;;  %p32_p4 = scmp.eq.s32.totalorder %s31_s27, 0 }
   0xc   : > { %p43_p5 = por %p42_p2, %p41_p1  ;;  %p134_p6 = scmp.eq.s32.totalorder %s712_s3, 3 }
   0xd   : > { %s1136_s25 = smov (%p29_p3, %s1134_s25), 0  ;;  %p715_p8 = scmp.ge.s32.totalorder %s903_s23, 4 }
   0xe   : > { %s993_s28 = scalar_select %p32_p4, %s883_s18, %s34_s26  }
   0xf   : > { %p995_p7 = por %p134_p6, %p41_p1  ;;  %165 = sbr.rel (%p715_p8) target bundleno = 29 (0x1d), region = 28 }
  0x16   : > { %168 = sbr.rel (!%p43_p5) target bundleno = 29 (0x1d), region = 32  ;;  %s170_s30 = sand.u32 (%p43_p5), 1, %s883_s18  }
  0x17   : > { %s716_s5 = sshll.u32 (%p43_p5), %s895_s21, 3  ;;  %s758_s6 = smul.u32 (%p43_p5), 40, %s170_s30 }
  0x18   : > { %s174_s9 = scalar_lea.vmem (%p43_p5), %s1119_s0, %s716_s5 }
  0x19   : > { %v210_v0 = vld [vmem:[%s174_s9] sm:$0xff] (%p43_p5)  ;;  %v212_v1 = vld [vmem:[%s174_s9 + $0x10] sm:$0xff] (%p43_p5)  ;;  %s172_s10 = scalar_lea.vmem (%p43_p5), [#allocation4], %s758_s6 }
  0x1a   : > { %v214_v2 = vld [vmem:[%s174_s9 + $0x20] sm:$0xff] (%p43_p5)  ;;  %v216_v3 = vld [vmem:[%s174_s9 + $0x30] sm:$0xff] (%p43_p5)  ;;  %211 = vst [vmem:[%s172_s10] sm:$0xff] (%p43_p5), %v210_v0  ;;  %213 = vst [vmem:[%s172_s10 + $0x8] sm:$0xff] (%p43_p5), %v212_v1 }
  0x1b   : > { %v218_v4 = vld [vmem:[%s174_s9 + $0x40] sm:$0xff] (%p43_p5)  ;;  %215 = vst [vmem:[%s172_s10 + $0x10] sm:$0xff] (%p43_p5), %v214_v2  ;;  %217 = vst [vmem:[%s172_s10 + $0x18] sm:$0xff] (%p43_p5), %v216_v3 }
  0x1c   : > { %219 = vst [vmem:[%s172_s10 + $0x20] sm:$0xff] (%p43_p5), %v218_v4 }
  0x1d PF: > { %p717_p9 = scmp.ge.s32.totalorder %s903_s23, 1  ;;  %p224_p10 = scmp.lt.s32.totalorder %s903_s23, 5 }
  0x1f   : > { %p225_p11 = pnand %p717_p9, %p224_p10 }
  0x20   : > { %s231_s11 = sand.u32 (!%p225_p11), 1, %s879_s17   ;;  %v255_v5 = vld [vmem:[%s1120_s1] sm:$0xff] (!%p225_p11)  ;;  %vm274_vm0 = vcmask (!%p225_p11), 293888   ;;  %v905_v6 = vmov (!%p225_p11), 0   ;;  %v263_v8 = vld [vmem:[%s1121_s2 + $0x8] sm:$0xff] (!%p225_p11)  ;;  %vm281_vm1 = vcmask (!%p225_p11), 1043456   ;;  %v361_v17 = vlaneseq (!%p225_p11) }
  0x21   : > { %228 = sbr.rel (%p225_p11) target bundleno = 1001 (0x3e9), region = 70  ;;  %s1011_s15 = sshll.u32 (!%p225_p11), %s231_s11, 4  ;;  %747 = vmatprep.mubr.msk.f32.mxu0 (!%p225_p11), %vm274_vm0, %v255_v5  ;;  %826 = vset.pattern.permute.xlu0 (!%p225_p11), %v905_v6  ;;  %v262_v7 = vld [vmem:[%s1121_s2] sm:$0xff] (!%p225_p11)  ;;  %v256_v16 = vld [vmem:[%s1120_s1 + $0x8] sm:$0xff] (!%p225_p11)  ;;  %v906_v21 = vmov (!%p225_p11), 0.0  }
  0x22   : > { %s759_s14 = smul.u32 (!%p225_p11), 40, %s231_s11  ;;  %266 = vperm.xlu0 (!%p225_p11), %826, %v262_v7   ;;  %s722_s6 = sshll.u32 (!%p225_p11), %s887_s19, 7  ;;  %v362_v18 = vand.u32 (!%p225_p11), 127, %v361_v17 }
  0x23   : > { %v363_v19 = vstv (!%p225_p11), %s722_s6  ;;  %p368_p12 = scmp.eq.s32.totalorder (!%p225_p11), %s891_s20, 0  ;;  %p369_p13 = scmp.eq.s32.totalorder (!%p225_p11), %s887_s19, 0 }
  0x24   : > { %s233_s17 = scalar_lea.vmem (!%p225_p11), [#allocation4], %s759_s14  ;;  %v364_v20 = vadd.s32 (!%p225_p11), %v363_v19, %v362_v18  ;;  %s1032_s7 = scalar_lea.vmem (!%p225_p11), [#allocation5], %s1011_s15 }
  0x25   : > { %v257_v9 = vld [vmem:[%s233_s17] sm:$0xff] (!%p225_p11)  ;;  %v258_v10 = vld [vmem:[%s233_s17 + $0x8] sm:$0xff] (!%p225_p11)  ;;  %v259_v11 = vld [vmem:[%s233_s17 + $0x10] sm:$0xff] (!%p225_p11)  ;;  %p370_p0 = pnand (!%p225_p11), %p369_p13, %p368_p12 }
  0x26   : > { %v750_v12 = vpack.c.bf16 (!%p225_p11), %v258_v10, %v257_v9  ;;  %v260_v13 = vld [vmem:[%s233_s17 + $0x18] sm:$0xff] (!%p225_p11)  ;;  %271 = vperm.xlu0 (!%p225_p11), %826, %v263_v8   ;;  %v261_v15 = vld [vmem:[%s233_s17 + $0x20] sm:$0xf] (!%p225_p11)  ;;  %vm365_vm2 = vcmp.lt.s32.totalorder (!%p225_p11), %v364_v20, 192 }
  0x27   : > { %v754_v14 = vpack.c.bf16 (!%p225_p11), %v260_v13, %v259_v11  ;;  %v723_v22 = vsel (!%p225_p11), %vm365_vm2, 1.0, %v906_v21 }
  0x28   : > { %751 = vmatprep.subr.bf16.mxu0 %v750_v12  ;;  %vm374_vm3 = vcmask (!%p370_p0), 64512   ;;  %v907_v29 = vmov (!%p370_p0), 0.0  }
  0x29   : > { %753 = vmatpush3.bf16.msra.mxu0 %v750_v12  ;;  %375 = vst.msk [vmem:[#allocation2] sm:$0xff] (!%p370_p0), %vm374_vm3, %v907_v29  ;;  %376 = vst.msk [vmem:[#allocation2 + $0x8] sm:$0xff] (!%p370_p0), %vm374_vm3, %v907_v29 }
  0x2a   : > { %755 = vmatprep.subr.bf16.mxu0 %v754_v14 }
  0x2d   : > { %757 = vmatpush3.bf16.msra.mxu0 %v754_v14 }
  0x2e   : > { %745 = vmatprep.subr.msk.mxu0 %vm281_vm1, %v261_v15 }
  0x31   : > { %746 = vmatpush3.msk.msra.mxu0 %vm281_vm1, %v261_v15 }
  0x32   : > { %748 = vmatmul.mubr.msk.f32.vlgmr.msra.gmra.mrb[0].mxu0 %vm274_vm0, %v256_v16 }
  0xa1   : > { %v267_v23 = vpop.permute.xlu0 %266 }
  0xa5   : > { %v272_v24 = vpop.permute.xlu0 %271 }
 0x101   : > { %373 = sbr.rel (%p370_p0) target bundleno = 264 (0x108), region = 78 }
 0x105   : > { %v749_v25 = vpop.f32.mrb[0].mxu0 }
 0x106   : > { %v1027_v26 = vadd.f32 %v749_v25, %v272_v24  ;;  %v351_v27 = vpop.f32.mrb[1].mxu0 }
 0x107   : > { %v1029_v28 = vadd.f32 %v351_v27, %v267_v23 }
 0x108 PF: > { %p724_p1 = scmp.ne.s32.totalorder %s891_s20, 0 }
 0x109   : > { %v380_v30 = vmul.f32 (!%p724_p1), %v723_v22, %v1029_v28  ;;  %v381_v31 = vmul.f32 (!%p724_p1), %v723_v22, %v1027_v26  ;;  %v382_v35 = vld [vmem:[#allocation2] sm:$0xff] (!%p724_p1)  ;;  %vm390_vm4 = vcmask (!%p724_p1), 7168   ;;  %v383_v38 = vld [vmem:[#allocation2 + $0x8] sm:$0xff] (!%p724_p1)  ;;  %vm403_vm5 = vcmask (!%p724_p1), 15368  }
 0x10a   : > { %379 = sbr.rel (%p724_p1) target bundleno = 436 (0x1b4), region = 82  ;;  %vm413_vm6 = vcmask (!%p724_p1), 23568  }
 0x10b   : > { %384 = vadd.xlane.f32.xlu0 (!%p724_p1), %v380_v30  ;;  %v395_v32 = vmul.f32 (!%p724_p1), %v380_v30, %v1029_v28  ;;  %v396_v33 = vmul.f32 (!%p724_p1), %v381_v31, %v1027_v26  ;;  %v408_v34 = vmul.f32 (!%p724_p1), %v381_v31, %v380_v30 }
 0x10d   : > { %397 = vadd.xlane.f32.xlu1 (!%p724_p1), %v395_v32 }
 0x10f   : > { %386 = vadd.xlane.f32.xlu0 (!%p724_p1), %v381_v31 }
 0x111   : > { %399 = vadd.xlane.f32.xlu1 %v396_v33 }
 0x113   : > { %409 = vadd.xlane.f32.xlu0 %v408_v34 }
 0x198   : > { %v385_v36 = vpop.xlane.xlu0 %384 }
 0x199   : > { %v388_v37 = vadd.f32 %v385_v36, %v382_v35 }
 0x19a   : > { %v398_v41 = vpop.xlane.xlu1 %397 }
 0x19b   : > { %391 = vst.msk [vmem:[#allocation2] sm:$0xff] %vm390_vm4, %v388_v37 }
 0x19c   : > { %v387_v39 = vpop.xlane.xlu0 %386 }
 0x19d   : > { %v389_v40 = vadd.f32 %v387_v39, %v383_v38 }
 0x19e   : > { %v400_v44 = vpop.xlane.xlu1 %399 }
 0x19f   : > { %392 = vst.msk [vmem:[#allocation2 + $0x8] sm:$0xff] %vm390_vm4, %v389_v40 }
 0x1a0   : > { %v410_v47 = vpop.xlane.xlu0 %409 }
 0x1a2   : > { %v393_v42 = vld [vmem:[#allocation2] sm:$0xff] }
 0x1a3   : > { %v401_v43 = vadd.f32 %v398_v41, %v393_v42 }
 0x1a5   : > { %404 = vst.msk [vmem:[#allocation2] sm:$0xff] %vm403_vm5, %v401_v43 }
 0x1a6   : > { %v394_v45 = vld [vmem:[#allocation2 + $0x8] sm:$0xff] }
 0x1a7   : > { %v402_v46 = vadd.f32 %v400_v44, %v394_v45 }
 0x1a9   : > { %405 = vst.msk [vmem:[#allocation2 + $0x8] sm:$0xff] %vm403_vm5, %v402_v46 }
 0x1ac   : > { %v406_v48 = vld [vmem:[#allocation2] sm:$0xff] }
 0x1ad   : > { %v411_v49 = vadd.f32 %v410_v47, %v406_v48 }
 0x1af   : > { %414 = vst.msk [vmem:[#allocation2] sm:$0xff] %vm413_vm6, %v411_v49 }
 0x1b0   : > { %v407_v50 = vld [vmem:[#allocation2 + $0x8] sm:$0xff] }
 0x1b1   : > { %v412_v51 = vadd.f32 %v410_v47, %v407_v50 }
 0x1b3   : > { %415 = vst.msk [vmem:[#allocation2 + $0x8] sm:$0xff] %vm413_vm6, %v412_v51 }
 0x1b4 PF: > { %p725_p2 = scmp.ne.s32.totalorder %s891_s20, 1 }
 0x1b5   : > { %s908_s8 = smov (!%p725_p2), 2   ;;  %s909_s9 = smov (!%p725_p2), 1   ;;  %v911_v0 = vmov (!%p725_p2), 0   ;;  %v553_v45 = vld [vmem:[%s1121_s2] sm:$0xff] (!%p725_p2)  ;;  %v554_v46 = vld [vmem:[%s1121_s2 + $0x8] sm:$0xff] (!%p725_p2)  ;;  %v912_v47 = vmov (!%p725_p2), 1  }
 0x1b6   : > { %419 = sbr.rel (%p725_p2) target bundleno = 993 (0x3e1), region = 86  ;;  %v420_v52 = vld [vmem:[#allocation2] sm:$0xff] (!%p725_p2)  ;;  %s910_s20 = smov (!%p725_p2), 127   ;;  %827 = vset.pattern.permute.xlu1 (!%p725_p2), %v911_v0  ;;  %828 = vset.pattern.permute.xlu0 (!%p725_p2), %v911_v0  ;;  %v913_v48 = vmov (!%p725_p2), 2  }
 0x1b7   : > { %v1040_v54 = vmul.f32 (!%p725_p2), 0.0052083335, %v420_v52  ;;  %s589_s14 = sld [smem:[#allocation3]] (!%p725_p2) }
 0x1b9   : > { %v424_v58 = vmul.f32 (!%p725_p2), %v1040_v54, %v1040_v54 }
 0x1ba   : > { %v421_v53 = vld [vmem:[#allocation2 + $0x8] sm:$0xff] (!%p725_p2) }
 0x1bb   : > { %v1042_v55 = vmul.f32 (!%p725_p2), 0.0052083335, %v421_v53 }
 0x1bd   : > { %v438_v56 = vmul.f32 %v1042_v55, %v1040_v54  ;;  %v425_v57 = vmul.f32 %v1042_v55, %v1042_v55 }
 0x1bf   : > { %440 = vrot.lane.b32.xlu0 %v438_v56, %s908_s8  ;;  %430 = vrot.lane.b32.xlu1 %v425_v57, %s909_s9 }
 0x1c3   : > { %428 = vrot.lane.b32.xlu0 %v424_v58, %s909_s9 }
 0x231   : > { %v441_v59 = vpop.permute.xlu0 %440  ;;  %v431_v1 = vpop.permute.xlu1 %430 }
 0x232   : > { %v1053_v60 = vsub.f32 %v1040_v54, %v441_v59  ;;  %v1056_v61 = vsub.f32 %v1042_v55, %v441_v59  ;;  %v435_v3 = vsub.f32 %v1042_v55, %v431_v1  ;;  %v914_v59 = vmov 3  }
 0x234   : > { %v446_v62 = vmul.f32 %v1053_v60, %v1053_v60  ;;  %v447_v63 = vmul.f32 %v1056_v61, %v1056_v61  ;;  %v1064_v5 = vadd.f32 1e-05, %v435_v3  ;;  %v503_v53 = vsub.f32 0.0, %v1053_v60 }
 0x235   : > { %v429_v2 = vpop.permute.xlu0 %428 }
 0x236   : > { %450 = vrot.lane.b32.xlu1 %v446_v62, %s910_s20  ;;  %452 = vrot.lane.b32.xlu0 %v447_v63, %s910_s20  ;;  %v434_v4 = vsub.f32 %v1040_v54, %v429_v2 }
 0x238   : > { %v1066_v6 = vadd.f32 1e-05, %v434_v4 }
 0x23a   : > { %v445_v7 = vmul.f32 %v1064_v5, %v1066_v6  ;;  %v474_v23 = vadd.f32 %v1064_v5, %v1066_v6 }
 0x2a8   : > { %v451_v8 = vpop.permute.xlu1 %450  ;;  %v453_v9 = vpop.permute.xlu0 %452 }
 0x2a9   : > { %v456_v10 = vsub.f32 %v445_v7, %v451_v8  ;;  %v457_v11 = vsub.f32 %v445_v7, %v453_v9 }
 0x2ab   : > { %v458_v12 = vmax.f32 %v456_v10, 1e-20  ;;  %v459_v13 = vmax.f32 %v457_v11, 1e-20 }
 0x2ad   : > { %837 = vrsqrt.f32 %v458_v12  ;;  %vm462_vm7 = vcmp.eq.f32.partialorder %v458_v12, inf  ;;  %v465_v17 = vand.u32 2147483648, %v458_v12  ;;  %vm464_vm8 = vcmp.eq.f32.partialorder %v458_v12, 0.0 }
 0x2ae   : > { %839 = vrsqrt.f32 %v459_v13  ;;  %vm469_vm9 = vcmp.eq.f32.partialorder %v459_v13, inf  ;;  %v472_v20 = vand.u32 2147483648, %v459_v13  ;;  %vm471_vm10 = vcmp.eq.f32.partialorder %v459_v13, 0.0 }
 0x2b7   : > { %v838_v14 = vpop.eup %837 }
 0x2b8   : > { %v840_v15 = vpop.eup %839  ;;  %v461_v16 = vmul.f32 %v838_v14, %v458_v12 }
 0x2b9   : > { %v468_v18 = vmul.f32 %v840_v15, %v459_v13 }
 0x2ba   : > { %v463_v19 = vsel %vm462_vm7, %v458_v12, %v461_v16 }
 0x2bb   : > { %v466_v21 = vsel %vm464_vm8, %v465_v17, %v463_v19  ;;  %v470_v22 = vsel %vm469_vm9, %v459_v13, %v468_v18 }
 0x2bc   : > { %v475_v24 = vmul.f32 2.0, %v466_v21  ;;  %v473_v25 = vsel %vm471_vm10, %v472_v20, %v470_v22  ;;  %v499_v49 = vadd.f32 %v466_v21, %v1064_v5 }
 0x2bd   : > { %v476_v27 = vmul.f32 2.0, %v473_v25  ;;  %v500_v51 = vadd.f32 %v473_v25, %v1066_v6 }
 0x2be   : > { %v477_v29 = vadd.f32 %v475_v24, %v474_v23 }
 0x2bf   : > { %v478_v30 = vadd.f32 %v476_v27, %v474_v23 }
 0x2c0   : > { %841 = vrsqrt.f32 %v477_v29  ;;  %vm481_vm11 = vcmp.eq.f32.partialorder %v477_v29, inf  ;;  %v484_v34 = vand.u32 2147483648, %v477_v29  ;;  %vm483_vm12 = vcmp.eq.f32.partialorder %v477_v29, 0.0 }
 0x2c1   : > { %843 = vrsqrt.f32 %v478_v30  ;;  %vm488_vm13 = vcmp.eq.f32.partialorder %v478_v30, inf  ;;  %v491_v37 = vand.u32 2147483648, %v478_v30  ;;  %vm490_vm14 = vcmp.eq.f32.partialorder %v478_v30, 0.0 }
 0x2ca   : > { %v842_v31 = vpop.eup %841 }
 0x2cb   : > { %v844_v32 = vpop.eup %843  ;;  %v480_v33 = vmul.f32 %v842_v31, %v477_v29 }
 0x2cc   : > { %v487_v35 = vmul.f32 %v844_v32, %v478_v30 }
 0x2cd   : > { %v482_v36 = vsel %vm481_vm11, %v477_v29, %v480_v33 }
 0x2ce   : > { %v485_v38 = vsel %vm483_vm12, %v484_v34, %v482_v36  ;;  %v489_v39 = vsel %vm488_vm13, %v478_v30, %v487_v35 }
 0x2cf   : > { %v493_v40 = vmul.f32 %v485_v38, %v466_v21  ;;  %v492_v41 = vsel %vm490_vm14, %v491_v37, %v489_v39 }
 0x2d0   : > { %v494_v42 = vmul.f32 %v492_v41, %v473_v25 }
 0x2d1   : > { %845 = vrcp.f32 %v493_v40 }
 0x2d2   : > { %847 = vrcp.f32 %v494_v42 }
 0x2db   : > { %v846_v43 = vpop.eup %845 }
 0x2dc   : > { %v848_v44 = vpop.eup %847  ;;  %507 = vrot.lane.b32.xlu1 %v846_v43, %s909_s9  ;;  %v501_v50 = vmul.f32 %v846_v43, %v499_v49 }
 0x2dd   : > { %509 = vrot.lane.b32.xlu0 %v848_v44, %s909_s9  ;;  %v502_v52 = vmul.f32 %v848_v44, %v500_v51 }
 0x2e0   : > { %517 = vperm.xlu1 %827, %v1040_v54  }
 0x2e1   : > { %522 = vperm.xlu0 %828, %v1042_v55   ;;  %v504_v55 = vsub.f32 0.0, %v1056_v61 }
 0x2e4   : > { %829 = vset.pattern.permute.xlu1 %v912_v47 }
 0x2e5   : > { %557 = vperm.xlu1 %829, %v553_v45   ;;  %830 = vset.pattern.permute.xlu0 %v912_v47 }
 0x2e6   : > { %562 = vperm.xlu0 %830, %v554_v46  }
 0x2e9   : > { %831 = vset.pattern.permute.xlu1 %v913_v48 }
 0x2ea   : > { %568 = vperm.xlu1 %831, %v553_v45   ;;  %833 = vset.pattern.permute.xlu0 %v913_v48 }
 0x2ee   : > { %832 = vset.pattern.permute.xlu1 %v912_v47 }
 0x2ef   : > { %529 = vperm.xlu1 %832, %v501_v50  }
 0x2f3   : > { %534 = vperm.xlu1 %832, %v502_v52  }
 0x2f7   : > { %834 = vset.pattern.permute.xlu1 %v913_v48 }
 0x34e   : > { %v508_v54 = vpop.permute.xlu1 %507 }
 0x34f   : > { %v513_v56 = vmul.f32 %v508_v54, %v503_v53  ;;  %v510_v57 = vpop.permute.xlu0 %509 }
 0x350   : > { %v514_v58 = vmul.f32 %v510_v57, %v504_v55 }
 0x351   : > { %541 = vperm.xlu0 %833, %v513_v56  }
 0x352   : > { %546 = vperm.xlu1 %834, %v514_v58  }
 0x355   : > { %835 = vset.pattern.permute.xlu0 %v914_v59 }
 0x356   : > { %572 = vperm.xlu1 %834, %v554_v46   ;;  %580 = vperm.xlu0 %835, %v553_v45  }
 0x35a   : > { %836 = vset.pattern.permute.xlu1 %v914_v59 }
 0x35b   : > { %584 = vperm.xlu1 %836, %v554_v46  }
 0x35f   : > { %v518_v62 = vpop.permute.xlu1 %517 }
 0x360   : > { %v523_v1 = vpop.permute.xlu0 %522  ;;  %v525_v3 = vsub.f32 %v1029_v28, %v518_v62 }
 0x361   : > { %v526_v4 = vsub.f32 %v1027_v26, %v523_v1  ;;  %v592_v26 = vstv %s589_s14 }
 0x364   : > { %v558_v63 = vpop.permute.xlu1 %557 }
 0x365   : > { %v563_v60 = vpop.permute.xlu0 %562 }
 0x369   : > { %v569_v0 = vpop.permute.xlu1 %568 }
 0x36e   : > { %v530_v2 = vpop.permute.xlu1 %529 }
 0x36f   : > { %v537_v6 = vmul.f32 %v530_v2, %v525_v3 }
 0x372   : > { %v535_v61 = vpop.permute.xlu1 %534 }
 0x373   : > { %v538_v9 = vmul.f32 %v535_v61, %v526_v4 }
 0x3d0   : > { %v542_v5 = vpop.permute.xlu0 %541 }
 0x3d1   : > { %v549_v7 = vmul.f32 %v542_v5, %v526_v4  ;;  %v547_v8 = vpop.permute.xlu1 %546 }
 0x3d2   : > { %v550_v10 = vmul.f32 %v547_v8, %v525_v3 }
 0x3d3   : > { %v551_v11 = vadd.f32 %v549_v7, %v537_v6 }
 0x3d4   : > { %v552_v12 = vadd.f32 %v550_v10, %v538_v9 }
 0x3d5   : > { %v573_v13 = vpop.permute.xlu1 %572  ;;  %v565_v14 = vmul.f32 %v558_v63, %v551_v11  ;;  %v581_v28 = vpop.permute.xlu0 %580 }
 0x3d6   : > { %v576_v15 = vmul.f32 %v573_v13, %v551_v11  ;;  %v575_v16 = vmul.f32 %v569_v0, %v552_v12  ;;  %v566_v17 = vmul.f32 %v563_v60, %v552_v12 }
 0x3d8   : > { %v577_v18 = vadd.f32 %v575_v16, %v565_v14  ;;  %v578_v19 = vadd.f32 %v576_v15, %v566_v17 }
 0x3da   : > { %v587_v20 = vadd.f32 %v581_v28, %v577_v18  ;;  %v585_v21 = vpop.permute.xlu1 %584 }
 0x3db   : > { %v588_v22 = vadd.f32 %v585_v21, %v578_v19 }
 0x3dc   : > { %vm590_vm15 = vcmp.ge.f32.partialorder %v587_v20, 0.0  ;;  %v593_v23 = vmul.f32 %v592_v26, %v587_v20 }
 0x3dd   : > { %vm591_vm0 = vcmp.ge.f32.partialorder %v588_v22, 0.0  ;;  %v594_v24 = vmul.f32 %v592_v26, %v588_v22 }
 0x3de   : > { %v595_v25 = vsel %vm590_vm15, %v587_v20, %v593_v23 }
 0x3df   : > { %597 = vst [vmem:[%s1032_s7] sm:$0xff] %v595_v25  ;;  %v596_v27 = vsel %vm591_vm0, %v588_v22, %v594_v24 }
 0x3e0   : > { %598 = vst [vmem:[%s1032_s7 + $0x8] sm:$0xff] %v596_v27 }
 0x3e1 PF: > { %605 = sbr.rel (!%p995_p7) target bundleno = 1001 (0x3e9), region = 90  ;;  %s727_s15 = sshll.u32 (%p995_p7), %s887_s19, 3 }
 0x3e2   : > { %s607_s26 = scalar_lea.vmem (%p995_p7), %s1123_s4, %s727_s15 }
 0x3e6   : > { %v637_v29 = vld [vmem:[%s1032_s7] sm:$0xff] (%p995_p7) }
 0x3e7   : > { %v639_v30 = vld [vmem:[%s1032_s7 + $0x8] sm:$0xff] (%p995_p7)  ;;  %638 = vst [vmem:[%s607_s26] sm:$0xff] (%p995_p7), %v637_v29 }
 0x3e8   : > { %640 = vst [vmem:[%s607_s26 + $0x10] sm:$0xff] %v639_v30 }
 0x3e9 PF: > { %s15_s23 = sadd.s32 1, %s903_s23   ;;  %s1125_s17 = smov %s883_s18 }
 0x3ea   : > { %p12_p3 = scmp.ge.s32.totalorder %s15_s23, 6   ;;  %s1126_s18 = smov %s993_s28 }
 0x3eb   : > { %s1127_s19 = smov %s895_s21  ;;  %s1128_s20 = smov %s899_s22 }
 0x3ec   : > { %s1129_s21 = smov %s1132_s24  ;;  %s1130_s22 = smov %s1136_s25 }
 0x3ed   :  { %14 = sbr.rel (!%p12_p3) target bundleno = 6 (0x6), region = 159 }

</bundles_post_ra>
